<compile_context>
chip_gen: v7x
topology: tpu7x:2x2x1
jax: 0.10.0
libtpu: 0.0.40
codegen_flags: <defaults>
</compile_context>

<pallas_src>
import math

import jax
import jax.numpy as jnp
from jax.experimental import pallas as pl
from jax.experimental.pallas import tpu as pltpu

NUM_HEADS = 8
OUT_DIM = 6          # nn.Linear(dim_emb, 6)


def _qkv_lane_block(E):
    # Q/K/V weight blocks start at 128-lane (vreg column) boundaries so the in-kernel
    # slices of the fused QKV output are lane-aligned (no rotates).
    return ((E + 127) // 128) * 128


def _small_slab_rows(E):
    # Row offsets inside the packed "small" weight slab (all multiples of 8).
    r_m = 0              # M  : (E, H)  head-indicator
    r_mt = E             # Mt : (H, E)  (8 rows)
    r_wa = E + 8         # W_attn = wo.T @ wfc.T / (HW+N)   (E, OUT_DIM)
    r_wi = 2 * E + 8     # W_img  = wfc.T / (HW+N)          (E, OUT_DIM)
    r_bo = 3 * E + 8     # b_out                             (1, OUT_DIM)
    rows = 3 * E + 16
    return r_m, r_mt, r_wa, r_wi, r_bo, rows


# ----------------------------------------------------------------------------
# Fused kernel: MHA(self-attn) + concat + avg-pool(1) + Linear(E -> 6)
# ----------------------------------------------------------------------------
def _make_kernel(B, N, E):
    D = E // NUM_HEADS
    scale = 1.0 / math.sqrt(D)
    blk = _qkv_lane_block(E)
    r_m, r_mt, r_wa, r_wi, r_bo, _ = _small_slab_rows(E)

    def kernel(x_ref, img_ref, wqkv_ref, small_ref, out_ref):
        # ---- fused QKV projection: ONE MXU matmul over all B*N rows -------------
        x = x_ref[...]                                               # (B*N, E)
        qkv = jnp.dot(x, wqkv_ref[0:E, :],
                      preferred_element_type=jnp.float32) + wqkv_ref[E:E + 1, :]
        # each block starts at a vreg-column boundary -> free lane slices
        q = qkv[:, 0:E]
        k = qkv[:, blk:blk + E]
        v = qkv[:, 2 * blk:2 * blk + E]

        # ---- packed small weights (all slices sublane/lane aligned) -------------
        M = small_ref[r_m:r_m + E, 0:NUM_HEADS]                      # (E, H)
        Mt = small_ref[r_mt:r_mt + NUM_HEADS, 0:E]                   # (H, E)
        W_at = small_ref[r_wa:r_wa + E, 0:OUT_DIM]                   # (E, 6)
        W_im = small_ref[r_wi:r_wi + E, 0:OUT_DIM]                   # (E, 6)
        b_o = small_ref[r_bo:r_bo + 1, 0:OUT_DIM]                    # (1, 6)

        # ---- batched scores: ONE matmul for every (b, c) pair -------------------
        # stacked rows ordered (b, c, n); every block is an N(=8)-row, sublane-tile
        # aligned slice, so the concatenations/slices are free.
        q_rows = [q[b * N:(b + 1) * N, :] for b in range(B)]
        stacked_q = jnp.concatenate(
            [q_rows[b] for b in range(B) for _ in range(B)], axis=0)  # (B*B*N, E)
        stacked_k = jnp.concatenate([k] * B, axis=0)                  # (B*B*N, E)
        stacked_v = jnp.concatenate([v] * B, axis=0)                  # (B*B*N, E)

        s_all = jnp.dot(stacked_q * stacked_k, M,
                        preferred_element_type=jnp.float32) * scale   # (B*B*N, H)

        # ---- softmax over the source axis c (per target position b) -------------
        p_blocks = []
        for b in range(B):
            s_b = [s_all[(b * B + c) * N:(b * B + c + 1) * N, :] for c in range(B)]
            m = s_b[0]
            for c in range(1, B):
                m = jnp.maximum(m, s_b[c])
            ex = [jnp.exp(s_b[c] - m) for c in range(B)]
            den = ex[0]
            for c in range(1, B):
                den = den + ex[c]
            inv = pl.reciprocal(den, approx=False)      # exact (tolerance margin)
            p_blocks.extend([e * inv for e in ex])
        p_all = jnp.concatenate(p_blocks, axis=0)                     # (B*B*N, H)

        # ---- expand heads (ONE matmul), weight V, folded projection -------------
        p_exp = jnp.dot(p_all, Mt, preferred_element_type=jnp.float32)   # (B*B*N, E)
        weighted = p_exp * stacked_v                                      # (B*B*N, E)
        proj = jnp.dot(weighted, W_at,
                       preferred_element_type=jnp.float32)                # (B*B*N, 6)
        attn = jnp.concatenate(
            [jnp.sum(proj[b * B * N:(b + 1) * B * N, :], axis=0, keepdims=True)
             for b in range(B)], axis=0)                                  # (B, 6)

        # ---- image path: sum over HW, folded projection --------------------------
        img_sum = jnp.sum(img_ref[...], axis=-1)                          # (B, E)
        img = jnp.dot(img_sum, W_im, preferred_element_type=jnp.float32)  # (B, 6)

        out_ref[...] = img + attn + b_o

    return kernel


# ----------------------------------------------------------------------------
# One-time weight packing / algebraic folding (outside the forward pass)
# ----------------------------------------------------------------------------
def prepare_params(params, hw, n):
    """Pack weights into two slabs and fold the linear tail:
         out = img_sum @ W_img + attn_raw_sum @ W_attn + b_out
       with W_img = wfc.T/(HW+N), W_attn = wo.T@wfc.T/(HW+N),
            b_out = bfc + N/(HW+N) * (bo @ wfc.T)."""
    E = params["wq"].shape[0]
    assert E % NUM_HEADS == 0
    D = E // NUM_HEADS
    blk = _qkv_lane_block(E)
    denom = float(hw + n)

    # fused QKV slab: rows 0:E weights (Q/K/V blocks at 128-lane boundaries), row E bias
    wqkv = jnp.zeros((E + 8, 3 * blk), jnp.float32)
    wqkv = wqkv.at[0:E, 0:E].set(params["wq"].T)
    wqkv = wqkv.at[0:E, blk:blk + E].set(params["wk"].T)
    wqkv = wqkv.at[0:E, 2 * blk:2 * blk + E].set(params["wv"].T)
    wqkv = wqkv.at[E, 0:E].set(params["bq"])
    wqkv = wqkv.at[E, blk:blk + E].set(params["bk"])
    wqkv = wqkv.at[E, 2 * blk:2 * blk + E].set(params["bv"])

    # head-indicator matrices (precomputed host-side, ride in the small slab)
    col = jnp.arange(E) // D
    M = (col[:, None] == jnp.arange(NUM_HEADS)[None, :]).astype(jnp.float32)  # (E, H)

    w_attn = (params["wo"].T @ params["wfc"].T) / denom            # (E, 6)
    w_img = params["wfc"].T / denom                                # (E, 6)
    b_out = params["bfc"] + (float(n) / denom) * (params["bo"] @ params["wfc"].T)

    r_m, r_mt, r_wa, r_wi, r_bo, rows = _small_slab_rows(E)
    small = jnp.zeros((rows, E), jnp.float32)
    small = small.at[r_m:r_m + E, 0:NUM_HEADS].set(M)
    small = small.at[r_mt:r_mt + NUM_HEADS, 0:E].set(M.T)
    small = small.at[r_wa:r_wa + E, 0:OUT_DIM].set(w_attn)
    small = small.at[r_wi:r_wi + E, 0:OUT_DIM].set(w_img)
    small = small.at[r_bo, 0:OUT_DIM].set(b_out)

    return {"wqkv": wqkv, "small": small}


# ----------------------------------------------------------------------------
# Wrapper
# ----------------------------------------------------------------------------
@jax.jit
def motion_estimator_forward(image_embs, patch_embs, packed):
    B, E, Hh, Ww = image_embs.shape
    _, N, _ = patch_embs.shape
    HW = Hh * Ww

    x_flat = patch_embs.reshape(B * N, E)       # contiguous -> free
    img_flat = image_embs.reshape(B, E, HW)     # nn.Flatten(2, 3): contiguous -> free

    vmem = pl.BlockSpec(memory_space=pltpu.MemorySpace.VMEM)
    return pl.pallas_call(
        _make_kernel(B, N, E),
        out_shape=jax.ShapeDtypeStruct((B, OUT_DIM), jnp.float32),
        in_specs=[vmem, vmem, vmem, vmem],      # no grid: whole operands in VMEM
        out_specs=vmem,
    )(x_flat, img_flat, packed["wqkv"], packed["small"])


# ----------------------------------------------------------------------------
# Pure-JAX reference (for correctness check)
# ----------------------------------------------------------------------------
def reference(image_embs, patch_embs, p):
    B, E, H, W = image_embs.shape
    L, N, _ = patch_embs.shape
    D = E // NUM_HEADS
    x = patch_embs                                  # (L=B, N, E), seq axis = 0
    q = x @ p["wq"].T + p["bq"]
    k = x @ p["wk"].T + p["bk"]
    v = x @ p["wv"].T + p["bv"]
    qh = q.reshape(L, N, NUM_HEADS, D)
    kh = k.reshape(L, N, NUM_HEADS, D)
    vh = v.reshape(L, N, NUM_HEADS, D)
    s = jnp.einsum("lnhd,mnhd->nhlm", qh, kh) / math.sqrt(D)
    a = jax.nn.softmax(s, axis=-1)
    o = jnp.einsum("nhlm,mnhd->lnhd", a, vh).reshape(L, N, E)
    o = o @ p["wo"].T + p["bo"]                     # (B, N, E)
    o_perm = jnp.transpose(o, (0, 2, 1))            # (B, E, N)
    img_flat = image_embs.reshape(B, E, H * W)
    cat = jnp.concatenate([img_flat, o_perm], axis=2)
    pooled = jnp.mean(cat, axis=2)
    return pooled @ p["wfc"].T + p["bfc"]


if __name__ == "__main__":
    B, E, H, W, N = 2, 32, 8, 8, 8                  # dim_emb=32, 8 heads -> head_dim=4
    key = jax.random.PRNGKey(0)
    ks = jax.random.split(key, 12)
    image_embs = jax.random.normal(ks[0], (B, E, H, W), jnp.float32)
    patch_embs = jax.random.normal(ks[1], (B, N, E), jnp.float32)

    wscale = 0.05
    params = {
        "wq": jax.random.normal(ks[2], (E, E), jnp.float32) * wscale,
        "wk": jax.random.normal(ks[3], (E, E), jnp.float32) * wscale,
        "wv": jax.random.normal(ks[4], (E, E), jnp.float32) * wscale,
        "wo": jax.random.normal(ks[5], (E, E), jnp.float32) * wscale,
        "bq": jax.random.normal(ks[6], (E,), jnp.float32) * wscale,
        "bk": jax.random.normal(ks[7], (E,), jnp.float32) * wscale,
        "bv": jax.random.normal(ks[8], (E,), jnp.float32) * wscale,
        "bo": jax.random.normal(ks[9], (E,), jnp.float32) * wscale,
        "wfc": jax.random.normal(ks[10], (OUT_DIM, E), jnp.float32) * wscale,
        "bfc": jax.random.normal(ks[11], (OUT_DIM,), jnp.float32) * wscale,
    }
    packed = prepare_params(params, hw=H * W, n=N)   # one-time packing / folding

    out = jax.block_until_ready(motion_estimator_forward(image_embs, patch_embs, packed))
    ref = reference(image_embs, patch_embs, params)

    assert out.shape == (B, OUT_DIM), out.shape
    assert jnp.allclose(out, ref, atol=1e-4, rtol=1e-4), (out, ref)
    print("KERNEL_OK")
</pallas_src>

<mosaic_0001>
module attributes {stable_mosaic.version = 11 : i64} {
  func.func @kernel(%arg0: memref<16x32xf32, #tpu.memory_space<vmem>>, %arg1: memref<2x32x64xf32, #tpu.memory_space<vmem>>, %arg2: memref<40x384xf32, #tpu.memory_space<vmem>>, %arg3: memref<112x32xf32, #tpu.memory_space<vmem>>, %arg4: memref<2x6xf32, #tpu.memory_space<vmem>>) attributes {dimension_semantics = [], scalar_prefetch = 0 : i64, scratch_operands = 0 : i64, tpu.core_type = #tpu.core_type<tc>} {
    %c0 = arith.constant 0 : index
    %c0_0 = arith.constant 0 : index
    %0 = vector.load %arg0[%c0, %c0_0] : memref<16x32xf32, #tpu.memory_space<vmem>>, vector<16x32xf32>
    %c0_1 = arith.constant 0 : index
    %c0_2 = arith.constant 0 : index
    %1 = vector.load %arg2[%c0_1, %c0_2] : memref<40x384xf32, #tpu.memory_space<vmem>>, vector<32x384xf32>
    %cst = arith.constant dense<0.000000e+00> : vector<16x384xf32>
    %2 = tpu.matmul %0, %1, %cst {dimension_numbers = #tpu.dot_dimension_numbers<[1], [0], [0], [1], [0, 0, 1, 1], [], []>} : vector<16x32xf32>, vector<32x384xf32>, vector<16x384xf32> -> vector<16x384xf32>
    %c32 = arith.constant 32 : index
    %c0_3 = arith.constant 0 : index
    %3 = vector.load %arg2[%c32, %c0_3] : memref<40x384xf32, #tpu.memory_space<vmem>>, vector<1x384xf32>
    %4 = vector.broadcast %3 : vector<1x384xf32> to vector<16x384xf32>
    %5 = arith.addf %2, %4 : vector<16x384xf32>
    %6 = vector.extract_strided_slice %5 {offsets = [0, 0], sizes = [16, 32], strides = [1, 1]} : vector<16x384xf32> to vector<16x32xf32>
    %7 = vector.extract_strided_slice %5 {offsets = [0, 128], sizes = [16, 32], strides = [1, 1]} : vector<16x384xf32> to vector<16x32xf32>
    %8 = vector.extract_strided_slice %5 {offsets = [0, 256], sizes = [16, 32], strides = [1, 1]} : vector<16x384xf32> to vector<16x32xf32>
    %c0_4 = arith.constant 0 : index
    %c0_5 = arith.constant 0 : index
    %9 = vector.load %arg3[%c0_4, %c0_5] : memref<112x32xf32, #tpu.memory_space<vmem>>, vector<32x8xf32>
    %c32_6 = arith.constant 32 : index
    %c0_7 = arith.constant 0 : index
    %10 = vector.load %arg3[%c32_6, %c0_7] : memref<112x32xf32, #tpu.memory_space<vmem>>, vector<8x32xf32>
    %c40 = arith.constant 40 : index
    %c0_8 = arith.constant 0 : index
    %11 = vector.load %arg3[%c40, %c0_8] : memref<112x32xf32, #tpu.memory_space<vmem>>, vector<32x6xf32>
    %c72 = arith.constant 72 : index
    %c0_9 = arith.constant 0 : index
    %12 = vector.load %arg3[%c72, %c0_9] : memref<112x32xf32, #tpu.memory_space<vmem>>, vector<32x6xf32>
    %c104 = arith.constant 104 : index
    %c0_10 = arith.constant 0 : index
    %13 = vector.load %arg3[%c104, %c0_10] : memref<112x32xf32, #tpu.memory_space<vmem>>, vector<1x6xf32>
    %14 = vector.extract_strided_slice %6 {offsets = [0, 0], sizes = [8, 32], strides = [1, 1]} : vector<16x32xf32> to vector<8x32xf32>
    %15 = vector.extract_strided_slice %6 {offsets = [8, 0], sizes = [8, 32], strides = [1, 1]} : vector<16x32xf32> to vector<8x32xf32>
    %16 = tpu.concatenate %14, %14, %15, %15 in 0 : vector<8x32xf32>, vector<8x32xf32>, vector<8x32xf32>, vector<8x32xf32> -> vector<32x32xf32>
    %17 = tpu.concatenate %7, %7 in 0 : vector<16x32xf32>, vector<16x32xf32> -> vector<32x32xf32>
    %18 = tpu.concatenate %8, %8 in 0 : vector<16x32xf32>, vector<16x32xf32> -> vector<32x32xf32>
    %19 = arith.mulf %16, %17 : vector<32x32xf32>
    %cst_11 = arith.constant dense<0.000000e+00> : vector<32x8xf32>
    %20 = tpu.matmul %19, %9, %cst_11 {dimension_numbers = #tpu.dot_dimension_numbers<[1], [0], [0], [1], [0, 0, 1, 1], [], []>} : vector<32x32xf32>, vector<32x8xf32>, vector<32x8xf32> -> vector<32x8xf32>
    %cst_12 = arith.constant 5.000000e-01 : f32
    %21 = vector.broadcast %cst_12 : f32 to vector<32x8xf32>
    %22 = arith.mulf %20, %21 : vector<32x8xf32>
    %23 = vector.extract_strided_slice %22 {offsets = [0, 0], sizes = [8, 8], strides = [1, 1]} : vector<32x8xf32> to vector<8x8xf32>
    %24 = vector.extract_strided_slice %22 {offsets = [8, 0], sizes = [8, 8], strides = [1, 1]} : vector<32x8xf32> to vector<8x8xf32>
    %25 = arith.maximumf %23, %24 : vector<8x8xf32>
    %26 = arith.subf %23, %25 : vector<8x8xf32>
    %27 = math.exp %26 : vector<8x8xf32>
    %28 = arith.subf %24, %25 : vector<8x8xf32>
    %29 = math.exp %28 : vector<8x8xf32>
    %30 = arith.addf %27, %29 : vector<8x8xf32>
    %31 = tpu.reciprocal %30 : vector<8x8xf32> -> vector<8x8xf32>
    %32 = arith.mulf %27, %31 : vector<8x8xf32>
    %33 = arith.mulf %29, %31 : vector<8x8xf32>
    %34 = vector.extract_strided_slice %22 {offsets = [16, 0], sizes = [8, 8], strides = [1, 1]} : vector<32x8xf32> to vector<8x8xf32>
    %35 = vector.extract_strided_slice %22 {offsets = [24, 0], sizes = [8, 8], strides = [1, 1]} : vector<32x8xf32> to vector<8x8xf32>
    %36 = arith.maximumf %34, %35 : vector<8x8xf32>
    %37 = arith.subf %34, %36 : vector<8x8xf32>
    %38 = math.exp %37 : vector<8x8xf32>
    %39 = arith.subf %35, %36 : vector<8x8xf32>
    %40 = math.exp %39 : vector<8x8xf32>
    %41 = arith.addf %38, %40 : vector<8x8xf32>
    %42 = tpu.reciprocal %41 : vector<8x8xf32> -> vector<8x8xf32>
    %43 = arith.mulf %38, %42 : vector<8x8xf32>
    %44 = arith.mulf %40, %42 : vector<8x8xf32>
    %45 = tpu.concatenate %32, %33, %43, %44 in 0 : vector<8x8xf32>, vector<8x8xf32>, vector<8x8xf32>, vector<8x8xf32> -> vector<32x8xf32>
    %cst_13 = arith.constant dense<0.000000e+00> : vector<32x32xf32>
    %46 = tpu.matmul %45, %10, %cst_13 {dimension_numbers = #tpu.dot_dimension_numbers<[1], [0], [0], [1], [0, 0, 1, 1], [], []>} : vector<32x8xf32>, vector<8x32xf32>, vector<32x32xf32> -> vector<32x32xf32>
    %47 = arith.mulf %46, %18 : vector<32x32xf32>
    %cst_14 = arith.constant dense<0.000000e+00> : vector<32x6xf32>
    %48 = tpu.matmul %47, %11, %cst_14 {dimension_numbers = #tpu.dot_dimension_numbers<[1], [0], [0], [1], [0, 0, 1, 1], [], []>} : vector<32x32xf32>, vector<32x6xf32>, vector<32x6xf32> -> vector<32x6xf32>
    %49 = vector.extract_strided_slice %48 {offsets = [0, 0], sizes = [16, 6], strides = [1, 1]} : vector<32x6xf32> to vector<16x6xf32>
    %cst_15 = arith.constant dense<0.000000e+00> : vector<6xf32>
    %50 = vector.multi_reduction <add>, %49, %cst_15 [0] : vector<16x6xf32> to vector<6xf32>
    %51 = vector.shape_cast %50 : vector<6xf32> to vector<1x6xf32>
    %52 = vector.extract_strided_slice %48 {offsets = [16, 0], sizes = [16, 6], strides = [1, 1]} : vector<32x6xf32> to vector<16x6xf32>
    %cst_16 = arith.constant dense<0.000000e+00> : vector<6xf32>
    %53 = vector.multi_reduction <add>, %52, %cst_16 [0] : vector<16x6xf32> to vector<6xf32>
    %54 = vector.shape_cast %53 : vector<6xf32> to vector<1x6xf32>
    %55 = tpu.concatenate %51, %54 in 0 : vector<1x6xf32>, vector<1x6xf32> -> vector<2x6xf32>
    %c0_17 = arith.constant 0 : index
    %c0_18 = arith.constant 0 : index
    %c0_19 = arith.constant 0 : index
    %56 = vector.load %arg1[%c0_17, %c0_18, %c0_19] : memref<2x32x64xf32, #tpu.memory_space<vmem>>, vector<2x32x64xf32>
    %cst_20 = arith.constant dense<0.000000e+00> : vector<2x32xf32>
    %57 = vector.multi_reduction <add>, %56, %cst_20 [2] : vector<2x32x64xf32> to vector<2x32xf32>
    %cst_21 = arith.constant dense<0.000000e+00> : vector<2x6xf32>
    %58 = tpu.matmul %57, %12, %cst_21 {dimension_numbers = #tpu.dot_dimension_numbers<[1], [0], [0], [1], [0, 0, 1, 1], [], []>} : vector<2x32xf32>, vector<32x6xf32>, vector<2x6xf32> -> vector<2x6xf32>
    %59 = arith.addf %58, %55 : vector<2x6xf32>
    %60 = vector.broadcast %13 : vector<1x6xf32> to vector<2x6xf32>
    %61 = arith.addf %59, %60 : vector<2x6xf32>
    %c0_22 = arith.constant 0 : index
    %c0_23 = arith.constant 0 : index
    %62 = vector.load %arg4[%c0_22, %c0_23] : memref<2x6xf32, #tpu.memory_space<vmem>>, vector<2x6xf32>
    tpu.vector_store %arg4[%c0_22, %c0_23], %61 {strides = array<i32>} : memref<2x6xf32, #tpu.memory_space<vmem>>, vector<2x6xf32>,
    return
  }
}

</mosaic_0001>

<bundles_post_ra>
// kernel: motion_estimator_forward.1
= control target key start
LH: loop header
LB: loop body
LE: loop exit
PB: predicated region body
PF: predicated region fallthrough
CT: control target
= control target key end

     0   :  { %v939_v7 = vmov 0.0   ;;  %vm50_vm0 = vcmask 261120   ;;  %s1133_s0 = inlined_call_operand.vmem [shape: f32[16,32], index: 0, kind: input, shape index: {}]   ;;  %s1134_s1 = inlined_call_operand.vmem [shape: f32[2,32,64], index: 1, kind: input, shape index: {}]   ;;  %s1135_s2 = inlined_call_operand.vmem [shape: f32[40,384], index: 2, kind: input, shape index: {}]   ;;  %s1136_s3 = inlined_call_operand.vmem [shape: f32[112,32], index: 3, kind: input, shape index: {}]   ;;  %s1137_s4 = inlined_call_operand.hbm [shape: f32[2,6], index: 4, kind: output, shape index: {}]  }
   0x1   :  { %v21_v0 = vld [vmem:[%s1135_s2 + $0x8] sm:$0xff]  ;;  %v24_v1 = vld [vmem:[%s1135_s2 + $0x20] sm:$0xff]  ;;  %v23_v4 = vld [vmem:[%s1135_s2 + $0x18] sm:$0xff]  ;;  %121 = vmatprep.mubr.f32.mxu0 %v939_v7 }
   0x2   :  { %v20_v2 = vld [vmem:[%s1135_s2] sm:$0xff]  ;;  %v861_v3 = vpack.c.bf16 %v24_v1, %v21_v0  ;;  %v27_v5 = vld [vmem:[%s1135_s2 + $0x38] sm:$0xff]  ;;  %v30_v6 = vld [vmem:[%s1135_s2 + $0x50] sm:$0xff] }
   0x3   :  { %v863_v8 = vpack.c.bf16 %v23_v4, %v20_v2  ;;  %v865_v9 = vpack.c.bf16 %v30_v6, %v27_v5  ;;  %v26_v10 = vld [vmem:[%s1135_s2 + $0x30] sm:$0xff]  ;;  %v29_v11 = vld [vmem:[%s1135_s2 + $0x48] sm:$0xff]  ;;  %v18_v12 = vld [vmem:[%s1133_s0] sm:$0xff] }
   0x4   :  { %862 = vmatprep.subr.bf16.mxu0 %v861_v3  ;;  %811 = vmatprep.mubr.msk.f32.mxu1 %vm50_vm0, %v18_v12 }
   0x5   :  { %9 = vsyncpa [#allocation3], 0  ;;  %864 = vmatpush1.bf16.msra.mxu0 %v863_v8  ;;  %v867_v13 = vpack.c.bf16 %v29_v11, %v26_v10  ;;  %v19_v14 = vld [vmem:[%s1133_s0 + $0x8] sm:$0xff]  ;;  %v209_v15 = vld [vmem:[%s1136_s3] sm:$0xff]  ;;  %v35_v21 = vlaneseq  ;;  %vm578_vm1 = vcmask 523264   ;;  %vm350_vm2 = vcmask 64512  }
   0x6   :  { %866 = vmatprep.subr.bf16.mxu0 %v865_v9  ;;  %v210_v16 = vld [vmem:[%s1136_s3 + $0x8] sm:$0xff]  ;;  %v211_v18 = vld [vmem:[%s1136_s3 + $0x10] sm:$0xff]  ;;  %v212_v19 = vld [vmem:[%s1136_s3 + $0x18] sm:$0xff]  ;;  %vm622_vm3 = vcmask 130112   ;;  %vm629_vm4 = vcmask 195712   ;;  %vm636_vm5 = vcmask 261312  }
   0x7   :  { %v877_v17 = vpack.c.bf16 %v210_v16, %v209_v15  ;;  %v881_v20 = vpack.c.bf16 %v212_v19, %v211_v18  ;;  %v1016_v22 = vshrl.u32 %v35_v21, 7  ;;  %v1022_v24 = vld [vmem:[%s1135_s2 + $0x60] ss:$8 sm:$0x7]  ;;  %v31_v44 = vld [vmem:[%s1135_s2 + $0x58] sm:$0xff]  ;;  %vm941_vm6 = vmmov 0  }
   0x8   :  { %v22_v40 = vld [vmem:[%s1135_s2 + $0x10] sm:$0xff]  ;;  %v25_v41 = vld [vmem:[%s1135_s2 + $0x28] sm:$0xff]  ;;  %v28_v43 = vld [vmem:[%s1135_s2 + $0x40] sm:$0xff]  ;;  %vm657_vm7 = vcmask 1041409   ;;  %vm549_vm8 = vcmask 48128   ;;  %vm568_vm9 = vcmask 1040384  }
   0x9   :  { %868 = vmatpush1.bf16.msra.mxu0 %v867_v13  ;;  %v37_v23 = vsub.s32 0, %v1016_v22  ;;  %v41_v25 = vsub.s32 1, %v1016_v22  ;;  %v869_v42 = vpack.c.bf16 %v25_v41, %v22_v40  ;;  %v873_v45 = vpack.c.bf16 %v31_v44, %v28_v43  ;;  %v213_v46 = vld [vmem:[%s1136_s3 + $0x20] sm:$0xff]  ;;  %v575_v49 = vld [vmem:[%s1134_s1 + $0x28] sm:$0xff]  ;;  %v576_v55 = vld [vmem:[%s1134_s1 + $0x30] sm:$0xff]  ;;  %s942_s6 = smov [#allocation2]  }
   0xa   :  { %878 = vmatprep.subr.bf16.mxu0 %v877_v17  ;;  %v574_v47 = vld [vmem:[%s1134_s1 + $0x20] sm:$0xff]  ;;  %v571_v52 = vld [vmem:[%s1134_s1 + $0x8] sm:$0xff]  ;;  %v594_v53 = vsel %vm578_vm1, %v575_v49, 0.0  ;;  %v572_v56 = vld [vmem:[%s1134_s1 + $0x10] sm:$0xff]  ;;  %v597_v57 = vsel %vm578_vm1, %v576_v55, 0.0  ;;  %v612_v40 = vand.u32 127, %v35_v21 }
   0xb   :  { %v38_v26 = vrot.slane %v1022_v24, %v37_v23  ;;  %v42_v27 = vrot.slane %v1022_v24, %v41_v25  ;;  %870 = vmatprep.subr.bf16.mxu1 %v869_v42  ;;  %v570_v48 = vld [vmem:[%s1134_s1] sm:$0xff]  ;;  %v591_v50 = vsel %vm578_vm1, %v574_v47, 0.0  ;;  %v582_v54 = vsel %vm578_vm1, %v571_v52, 0.0  ;;  %v577_v59 = vld [vmem:[%s1134_s1 + $0x38] sm:$0xff]  ;;  %v214_v63 = vld [vmem:[%s1136_s3 + $0x28] sm:$0xff]  ;;  %s744_s7 = sshll.u32 %s942_s6, 4  ;;  %s745_s7 = int_to_ptr.vmem [resolvable:$true] %s744_s7 }
   0xc   :  { %753 = vmatmul.mubr.msk.f32.vlgmr.msra.gmra.mrb[0].mxu0 %vm50_vm0, %v18_v12  ;;  %872 = vmatpush3.bf16.msra.mxu1 %v869_v42  ;;  %v579_v51 = vsel %vm578_vm1, %v570_v48, 0.0  ;;  %v585_v58 = vsel %vm578_vm1, %v572_v56, 0.0  ;;  %v573_v60 = vld [vmem:[%s1134_s1 + $0x18] sm:$0xff]  ;;  %v600_v61 = vsel %vm578_vm1, %v577_v59, 0.0  ;;  %v215_v0 = vld [vmem:[%s1136_s3 + $0x30] sm:$0xff]  ;;  %v217_v42 = vld [vmem:[%s1136_s3 + $0x40] sm:$0xff]  ;;  %v615_v44 = vsub.s32 %v612_v40, %v1016_v22  ;;  %p920_p1 = scmp.lt.s32.totalorder %s745_s7, %s745_s7 }
   0xd   :  { %127 = vmatprep.mubr.f32.mxu0 %v939_v7  ;;  %880 = vmatpush3.bf16.msra.mxu0 %v877_v17  ;;  %v588_v62 = vsel %vm578_vm1, %v573_v60, 0.0  ;;  %v885_v1 = vpack.c.bf16 %v215_v0, %v214_v63  ;;  %v216_v41 = vld [vmem:[%s1136_s3 + $0x38] sm:$0xff]  ;;  %v624_v55 = vadd.s32 4294967280, %v612_v40  ;;  %v940_v60 = vmov 0.0|0.0   ;;  %s915_s8 = scalar_lea.vmem %s745_s7, 32 }
   0xe   :  { %882 = vmatprep.subr.bf16.mxu0 %v881_v20  ;;  %874 = vmatprep.subr.bf16.mxu1 %v873_v45  ;;  %v889_v43 = vpack.c.bf16 %v217_v42, %v216_v41  ;;  %v220_v0 = vld [vmem:[%s1136_s3 + $0x58] sm:$0xff]  ;;  %vm736_vm10 = vcmask 41984   ;;  %p916_p0 = scmp.ne.s32.totalorder %s745_s7, %s915_s8  ;;  %p921_p2 = scmp.lt.s32.totalorder %s915_s8, %s915_s8 }
   0xf   :  { %592 = vadd.xlane.f32.xlu1 %v591_v50  ;;  %580 = vadd.xlane.f32.xlu0 %v579_v51  ;;  %v218_v50 = vld [vmem:[%s1136_s3 + $0x48] sm:$0xff]  ;;  %v219_v51 = vld [vmem:[%s1136_s3 + $0x50] sm:$0xff]  ;;  %v627_v59 = vsub.s32 %v624_v55, %v1016_v22 }
  0x10   :  { %754 = vmatmul.mubr.msk.f32.gmra.mrb[2].mxu0 %vm50_vm0, %v19_v14  ;;  %876 = vmatpush3.bf16.msra.mxu1 %v873_v45  ;;  %p922_p3 = por %p921_p2, %p920_p1 }
  0x11   :  { %884 = vmatpush3.bf16.msra.mxu0 %v881_v20  ;;  %828 = vmatprep.subr.mxu1 %v213_v46 }
  0x12   :  { %893 = vmatprep.subr.bf16.mxu0 %v940_v60  ;;  %p923_p4 = pnand %p922_p3, %p916_p0 }
  0x13   :  { %812 = vmatmul.mubr.msk.f32.vlgmr.msra.gmra.mrb[0].mxu1 %vm50_vm0, %v19_v14  ;;  %595 = vadd.xlane.f32.xlu1 %v594_v53 }
  0x14   :  { %829 = vmatpush3.msra.mxu1 %v213_v46  ;;  %583 = vadd.xlane.f32.xlu0 %v582_v54  ;;  %v617_v46 = vadd.s32 4294967288, %v612_v40 }
  0x15   :  { %886 = vmatprep.subr.bf16.mxu1 %v885_v1 }
  0x16   :  { %v620_v48 = vsub.s32 %v617_v46, %v1016_v22 }
  0x17   :  { %598 = vadd.xlane.f32.xlu1 %v597_v57  ;;  %v894_v57 = vpack.c.bf16 %v219_v51, %v218_v50  ;;  %v770_v50 = vld [vmem:[%s1136_s3 + $0x68] ss:$0 sm:$0xff] }
  0x18   :  { %586 = vadd.xlane.f32.xlu0 %v585_v58  ;;  %v631_v58 = vadd.s32 4294967272, %v612_v40 }
  0x1a   :  { %v634_v63 = vsub.s32 %v631_v58, %v1016_v22 }
  0x1b   :  { %601 = vadd.xlane.f32.xlu1 %v600_v61 }
  0x1c   :  { %589 = vadd.xlane.f32.xlu0 %v588_v62 }
  0xdf   :  { %v123_v28 = vpop.f32.mrb[0].mxu0 }
  0xe0   :  { %v124_v29 = vadd.f32 %v123_v28, %v38_v26  ;;  %v125_v30 = vpop.f32.mrb[1].mxu0 }
  0xe1   :  { %v126_v31 = vadd.f32 %v125_v30, %v42_v27 }
  0xe3   :  { %v223_v32 = vmul.f32 %v126_v31, %v124_v29  ;;  %v129_v33 = vpop.f32.mrb[2].mxu0 }
  0xe4   :  { %v130_v34 = vadd.f32 %v129_v33, %v38_v26  ;;  %v131_v35 = vpop.f32.mrb[3].mxu0 }
  0xe5   :  { %v132_v36 = vadd.f32 %v131_v35, %v42_v27  ;;  %822 = vmatprep.mubr.msk.f32.mxu0 %vm50_vm0, %v223_v32 }
  0xe6   :  { %v225_v37 = vmul.f32 %v130_v34, %v126_v31 }
  0xe7   :  { %v224_v38 = vmul.f32 %v132_v36, %v124_v29  ;;  %v226_v39 = vmul.f32 %v132_v36, %v130_v34  ;;  %v813_v36 = vpop.f32.mrb[0].mxu1 }
  0xe9   :  { %823 = vmatmul.mubr.msk.f32.vlgmr.msra.gmra.mrb[4].mxu0 %vm50_vm0, %v224_v38  ;;  %v200_v38 = vpop.f32.mrb[1].mxu1 }
  0xea   :  { %825 = vmatprep.mubr.msk.f32.mxu0 %vm50_vm0, %v225_v37  ;;  %v593_v37 = vpop.xlane.xlu1 %592  ;;  %895 = vmatpush3.bf16.msra.mxu0 %v894_v57 }
  0xeb   :  { %v641_v49 = vrot.slane %v593_v37, %v615_v44  ;;  %896 = vmatprep.subr.bf16.mxu0 %v940_v60 }
  0xed   :  { %826 = vmatmul.mubr.msk.f32.gmra.mrb[6].mxu0 %vm50_vm0, %v226_v39  ;;  %v581_v39 = vpop.xlane.xlu0 %580 }
  0xee   :  { %v596_v45 = vpop.xlane.xlu1 %595  ;;  %v616_v21 = vrot.slane %v581_v39, %v615_v44  ;;  %858 = vmatprep.mubr.msk.f32.mxu0 %vm941_vm6, %v939_v7 }
  0xef   :  { %v645_v52 = vrot.slane %v596_v45, %v620_v48 }
  0xf1   :  { %v584_v47 = vpop.xlane.xlu0 %583  ;;  %v646_v61 = vsel %vm622_vm3, %v645_v52, %v641_v49 }
  0xf2   :  { %v621_v53 = vrot.slane %v584_v47, %v620_v48  ;;  %v599_v54 = vpop.xlane.xlu1 %598 }
  0xf4   :  { %v623_v62 = vsel %vm622_vm3, %v621_v53, %v616_v21 }
  0xf5   :  { %v587_v56 = vpop.xlane.xlu0 %586 }
 0x1bc   :  { %v824_v2 = vpop.f32.mrb[4].mxu0 }
 0x1bd   :  { %v325_v3 = vmul.f32 0.5, %v824_v2  ;;  %v305_v4 = vpop.f32.mrb[5].mxu0  ;;  %v650_v2 = vrot.slane %v599_v54, %v627_v59 }
 0x1be   :  { %v324_v5 = vmul.f32 0.5, %v305_v4  ;;  %v602_v4 = vpop.xlane.xlu1 %601 }
 0x1c0   :  { %v328_v6 = vmax.f32 %v324_v5, %v325_v3  ;;  %v827_v8 = vpop.f32.mrb[6].mxu0 }
 0x1c1   :  { %v327_v9 = vmul.f32 0.5, %v827_v8  ;;  %v315_v10 = vpop.f32.mrb[7].mxu0  ;;  %v655_v8 = vrot.slane %v602_v4, %v634_v63 }
 0x1c2   :  { %v329_v11 = vsub.f32 %v324_v5, %v328_v6  ;;  %v332_v12 = vsub.f32 %v325_v3, %v328_v6  ;;  %v326_v13 = vmul.f32 0.5, %v315_v10  ;;  %v628_v3 = vrot.slane %v587_v56, %v627_v59  ;;  %v590_v5 = vpop.xlane.xlu0 %589 }
 0x1c3   :  { %v651_v10 = vsel %vm629_vm4, %v650_v2, %v646_v61 }
 0x1c4   :  { %v330_v14 = vmul.f32 1.442695, %v329_v11  ;;  %v333_v15 = vmul.f32 1.442695, %v332_v12  ;;  %v339_v16 = vmax.f32 %v326_v13, %v327_v9  ;;  %v630_v11 = vsel %vm629_vm4, %v628_v3, %v623_v62 }
 0x1c5   :  { %v656_v12 = vsel %vm636_vm5, %v655_v8, %v651_v10 }
 0x1c6   :  { %903 = vpow2.f32 %v330_v14  ;;  %v340_v17 = vsub.f32 %v326_v13, %v339_v16  ;;  %v343_v18 = vsub.f32 %v327_v9, %v339_v16  ;;  %v635_v9 = vrot.slane %v590_v5, %v634_v63 }
 0x1c7   :  { %905 = vpow2.f32 %v333_v15  ;;  %v45_v15 = vsub.s32 2, %v1016_v22 }
 0x1c8   :  { %v341_v19 = vmul.f32 1.442695, %v340_v17  ;;  %v344_v20 = vmul.f32 1.442695, %v343_v18  ;;  %v637_v13 = vsel %vm636_vm5, %v635_v9, %v630_v11 }
 0x1c9   :  { %v658_v14 = vsel %vm657_vm7, %v656_v12, %v637_v13  ;;  %v46_v16 = vrot.slane %v1022_v24, %v45_v15 }
 0x1ca   :  { %907 = vpow2.f32 %v341_v19 }
 0x1cb   :  { %909 = vpow2.f32 %v344_v20  ;;  %v206_v17 = vadd.f32 %v813_v36, %v46_v16  ;;  %v201_v18 = vadd.f32 %v200_v38, %v46_v16 }
 0x1d0   :  { %v904_v23 = vpop.eup %903 }
 0x1d1   :  { %v906_v25 = vpop.eup %905 }
 0x1d2   :  { %v335_v26 = vadd.f32 %v906_v25, %v904_v23 }
 0x1d4   :  { %v908_v27 = vpop.eup %907  ;;  %911 = vrcp.f32 %v335_v26 }
 0x1d5   :  { %v910_v28 = vpop.eup %909 }
 0x1d6   :  { %v346_v29 = vadd.f32 %v910_v28, %v908_v27 }
 0x1d8   :  { %913 = vrcp.f32 %v346_v29 }
 0x1de   :  { %v912_v30 = vpop.eup %911 }
 0x1df   :  { %v337_v31 = vmul.f32 %v912_v30, %v904_v23  ;;  %v338_v32 = vmul.f32 %v912_v30, %v906_v25 }
 0x1e1   :  { %830 = vmatprep.mubr.msk.f32.mxu1 %vm350_vm2, %v337_v31 }
 0x1e2   :  { %v914_v33 = vpop.eup %913  ;;  %831 = vmatmul.mubr.msk.f32.vlgmr.msra.gmra.mrb[2].mxu1 %vm350_vm2, %v338_v32 }
 0x1e3   :  { %v348_v34 = vmul.f32 %v914_v33, %v908_v27  ;;  %v349_v35 = vmul.f32 %v914_v33, %v910_v28  ;;  %888 = vmatpush3.bf16.msra.mxu1 %v885_v1  ;;  %v221_v1 = vld [vmem:[%s1136_s3 + $0x60] sm:$0xff] }
 0x1e4   :  { %890 = vmatprep.subr.bf16.mxu1 %v889_v43  ;;  %v897_v6 = vpack.c.bf16 %v221_v1, %v220_v0 }
 0x1e5   :  { %833 = vmatprep.mubr.msk.f32.mxu1 %vm350_vm2, %v348_v34 }
 0x1e6   :  { %834 = vmatmul.mubr.msk.f32.gmra.mrb[4].mxu1 %vm350_vm2, %v349_v35  ;;  %898 = vmatpush3.bf16.msra.mxu0 %v897_v6 }
 0x1e7   :  { %892 = vmatpush3.bf16.msra.mxu1 %v889_v43 }
 0x1e9   :  { %859 = vmatmul.mubr.msk.f32.vlgmr.msra.gmra.mrb[8].mxu0 %vm50_vm0, %v658_v14 }
 0x2b5   :  { %v832_v7 = vpop.f32.mrb[2].mxu1 }
 0x2b6   :  { %v449_v19 = vmul.f32 %v832_v7, %v206_v17  ;;  %v429_v20 = vpop.f32.mrb[3].mxu1 }
 0x2b7   :  { %v448_v23 = vmul.f32 %v429_v20, %v201_v18 }
 0x2b9   :  { %v835_v25 = vpop.f32.mrb[4].mxu1  ;;  %844 = vmatprep.mubr.msk.f32.mxu1 %vm50_vm0, %v448_v23 }
 0x2ba   :  { %v451_v26 = vmul.f32 %v835_v25, %v206_v17  ;;  %v439_v27 = vpop.f32.mrb[5].mxu1  ;;  %845 = vmatmul.mubr.msk.f32.vlgmr.msra.gmra.mrb[6].mxu1 %vm50_vm0, %v449_v19 }
 0x2bb   :  { %v450_v28 = vmul.f32 %v439_v27, %v201_v18 }
 0x2bc   :  { %v727_v22 = vpop.f32.mrb[8].mxu0 }
 0x2bd   :  { %847 = vmatprep.mubr.msk.f32.mxu1 %vm50_vm0, %v450_v28  ;;  %v860_v24 = vpop.f32.mrb[9].mxu0 }
 0x2be   :  { %848 = vmatmul.mubr.msk.f32.gmra.mrb[8].mxu1 %vm50_vm0, %v451_v26 }
 0x38d   :  { %v846_v29 = vpop.f32.mrb[6].mxu1 }
 0x38e   :  { %v551_v30 = vsel %vm549_vm8, %v846_v29, 0.0  ;;  %v530_v31 = vpop.f32.mrb[7].mxu1 }
 0x38f   :  { %v550_v32 = vsel %vm549_vm8, %v530_v31, 0.0 }
 0x390   :  { %v552_v33 = vadd.f32 %v551_v30, %v550_v32 }
 0x391   :  { %v849_v34 = vpop.f32.mrb[8].mxu1 }
 0x392   :  { %v553_v35 = vrot.slane %v552_v33, 4  ;;  %v560_v36 = vsel %vm549_vm8, %v849_v34, 0.0  ;;  %v540_v37 = vpop.f32.mrb[9].mxu1 }
 0x393   :  { %v559_v38 = vsel %vm549_vm8, %v540_v37, 0.0 }
 0x394   :  { %v554_v39 = vadd.f32 %v553_v35, %v552_v33  ;;  %v561_v40 = vadd.f32 %v560_v36, %v559_v38 }
 0x396   :  { %v555_v41 = vrot.slane %v554_v39, 2  ;;  %v562_v42 = vrot.slane %v561_v40, 4 }
 0x398   :  { %v556_v43 = vadd.f32 %v555_v41, %v554_v39  ;;  %v563_v44 = vadd.f32 %v562_v42, %v561_v40 }
 0x39a   :  { %v564_v45 = vrot.slane %v563_v44, 2  ;;  %v557_v46 = vrot.slane %v556_v43, 1 }
 0x39c   :  { %v565_v47 = vadd.f32 %v564_v45, %v563_v44  ;;  %v558_v49 = vadd.f32 %v557_v46, %v556_v43 }
 0x39e   :  { %v566_v48 = vrot.slane %v565_v47, 1 }
 0x3a0   :  { %v567_v21 = vadd.f32 %v566_v48, %v565_v47 }
 0x3a2   :  { %v569_v51 = vsel %vm568_vm9, %v558_v49, %v567_v21 }
 0x3a3   :  { %v728_v52 = vadd.f32 %v727_v22, %v569_v51 }
 0x3a5   :  { %v735_v53 = vadd.f32 %v770_v50, %v728_v52 }
 0x3a7   :  { %737 = vst.msk [vmem:[#allocation2] sm:$0x3] %vm736_vm10, %v735_v53 }
 0x3a8   :  { %926 = shalt.err (!%p923_p4)
}
 0x3a9   :  { %s927_s11 = scalar_lea.hbm %s1137_s4, 32 }
 0x3aa   :  { %p928_p5 = scmp.ne.s32.totalorder %s1137_s4, %s927_s11  ;;  %p931_p6 = scmp.lt.u32.totalorder %s927_s11, %s1137_s4 }
 0x3ac   :  { %p933_p7 = pnand %p931_p6, %p928_p5 }
 0x3ae   :  { %936 = shalt.err (!%p933_p7)
}
 0x3af   :  { %747 = dma.vmem_to_hbm [thread:$0]  %s745_s7, 32, %s1137_s4, [#allocation3]  }
 0x3b0   :  { %937 = dma.done.wait [#allocation3], 32  }
 0x3b1   :  { %938 = vsyncadd [#allocation3], 4294967264 }
 0x3b2   :  { %751 = vsyncpa [#allocation3], 1 }

</bundles_post_ra>
